<compile_context>
chip_gen: v5e
topology: v5e:2x2
jax: 0.10.0
libtpu: 0.0.40
codegen_flags: <defaults>
</compile_context>

<pallas_src>
import jax
import jax.numpy as jnp
from jax import lax
from jax.experimental import pallas as pl
from jax.experimental.pallas import tpu as pltpu


# ----------------------------- Pallas kernels ------------------------------ #

def _lane_fold(v):
    """Sum 128-lane groups of a (C, T) array -> (C, 128). T is a multiple of 128."""
    t = v.shape[-1] // 128
    out = v[:, :128]
    for j in range(1, t):
        out = out + v[:, j * 128:(j + 1) * 128]
    return out


def _conv_mm_kernel(w_ref, a_ref, y_ref, psum_ref, pssq_ref, acc_ref):
    """yT(C, Mtile) = W(C, Ktile) @ A^T(Ktile, Mtile), K-tiled, + partial stats."""
    k = pl.program_id(1)

    @pl.when(k == 0)
    def _():
        acc_ref[...] = jnp.zeros_like(acc_ref)

    acc_ref[...] += jnp.dot(w_ref[...], a_ref[...],
                            preferred_element_type=jnp.float32)

    @pl.when(k == pl.num_programs(1) - 1)
    def _():
        y = acc_ref[...]
        y_ref[...] = y.astype(y_ref.dtype)
        # per-M-block partial per-channel sums (lane groups folded to 128 lanes)
        psum_ref[...] = _lane_fold(y)
        pssq_ref[...] = _lane_fold(y * y)


def _bn_relu_kernel(y_ref, scale_ref, shift_ref, o_ref):
    y = y_ref[...].astype(jnp.float32)
    o_ref[...] = jnp.maximum(y * scale_ref[...] + shift_ref[...], 0.0)


def _bn_res_relu_kernel(y_ref, res_ref, scale_ref, shift_ref, o_ref):
    y = y_ref[...].astype(jnp.float32)
    out = y * scale_ref[...] + shift_ref[...] + res_ref[...]
    o_ref[...] = jnp.maximum(out, 0.0)


# ------------------------------ host wrapper ------------------------------- #

def _triple(v):
    return (v, v, v) if isinstance(v, int) else tuple(v)


def _pad2(a, shape):
    out = jnp.zeros(shape, a.dtype)
    return out.at[:a.shape[0], :a.shape[1]].set(a)


def conv3d_block(x, w, b, gamma, beta, *, stride, padding, residual, eps=1e-5):
    """Forward of the PyTorch Conv3d module (conv -> BN(train) -> [+x] -> relu)."""
    stride, padding = _triple(stride), _triple(padding)
    N, Cin, D, H, W = x.shape
    Cout, _, KD, KH, KW = w.shape
    sd, sh, sw = stride
    pd, ph, pw = padding
    OD = (D + 2 * pd - KD) // sd + 1
    OH = (H + 2 * ph - KH) // sh + 1
    OW = (W + 2 * pw - KW) // sw + 1

    # ---- im2col (glue, plain JAX) ----
    xp = jnp.pad(x, ((0, 0), (0, 0), (pd, pd), (ph, ph), (pw, pw)))
    cols = []
    for kd in range(KD):
        for kh in range(KH):
            for kw in range(KW):
                cols.append(xp[:, :, kd:kd + sd * OD:sd,
                               kh:kh + sh * OH:sh,
                               kw:kw + sw * OW:sw])
    patches = jnp.stack(cols, axis=2)                    # (N, Cin, Kvol, OD, OH, OW)
    K = Cin * KD * KH * KW
    M = N * OD * OH * OW
    # (Cin, Kvol, N, OD, OH, OW) -> (K, M): M goes on the lane axis.
    At = patches.transpose(1, 2, 0, 3, 4, 5).reshape(K, M)
    Wm = w.reshape(Cout, K)

    # Conv bias is mathematically cancelled by the BN mean subtraction.
    del b

    # ---- TPU-friendly tile/padded shapes ----
    tm = min(512, pl.cdiv(M, 128) * 128)                 # lane-dim tile (output posns)
    Mp = pl.cdiv(M, tm) * tm
    Kp128 = pl.cdiv(K, 128) * 128
    tk = Kp128 if Kp128 <= 1024 else 512                 # K tile
    Kp = pl.cdiv(K, tk) * tk
    C8 = max(8, pl.cdiv(Cout, 8) * 8)                    # Cout pads to sublane granule
    nm, nk = Mp // tm, Kp // tk

    # bf16 operands for the MXU; f32 accumulation happens inside the kernel.
    At_p = _pad2(At.astype(jnp.bfloat16), (Kp, Mp))
    W_p = _pad2(Wm.astype(jnp.bfloat16), (C8, Kp))

    cparams1 = pltpu.CompilerParams(
        dimension_semantics=("parallel", "arbitrary"),
        vmem_limit_bytes=48 * 1024 * 1024)

    # ---- kernel 1: conv matmul (K-tiled) + per-block partial channel stats ----
    y_p, psum, pssq = pl.pallas_call(
        _conv_mm_kernel,
        out_shape=(jax.ShapeDtypeStruct((C8, Mp), jnp.bfloat16),
                   jax.ShapeDtypeStruct((C8, nm * 128), jnp.float32),
                   jax.ShapeDtypeStruct((C8, nm * 128), jnp.float32)),
        grid_spec=pltpu.PrefetchScalarGridSpec(
            num_scalar_prefetch=0, grid=(nm, nk),
            in_specs=[pl.BlockSpec((C8, tk), lambda i, k: (0, k)),   # W
                      pl.BlockSpec((tk, tm), lambda i, k: (k, i))],  # A^T
            out_specs=(pl.BlockSpec((C8, tm), lambda i, k: (0, i)),
                       pl.BlockSpec((C8, 128), lambda i, k: (0, i)),
                       pl.BlockSpec((C8, 128), lambda i, k: (0, i))),
            scratch_shapes=[pltpu.VMEM((C8, tm), jnp.float32)]),
        compiler_params=cparams1,
    )(W_p, At_p)

    # ---- BN training statistics (padded rows/cols contribute exact zeros) ----
    csum = psum.sum(axis=1)
    cssq = pssq.sum(axis=1)
    mean = csum / M
    var = jnp.maximum(cssq / M - mean * mean, 0.0)  # biased, as PyTorch BN training

    gamma_p = _pad2(gamma.astype(jnp.float32)[:, None], (C8, 1))
    beta_p = _pad2(beta.astype(jnp.float32)[:, None], (C8, 1))
    scale = gamma_p * lax.rsqrt(var[:, None] + eps)
    shift = beta_p - mean[:, None] * scale

    cparams2 = pltpu.CompilerParams(
        dimension_semantics=("parallel",),
        vmem_limit_bytes=48 * 1024 * 1024)

    # ---- kernel 2: folded-BN FMA (+residual) + ReLU ----
    if residual:
        assert Cin == Cout and (OD, OH, OW) == (D, H, W), \
            "residual=True requires matching shapes"
        res = x.transpose(1, 0, 2, 3, 4).reshape(Cin, M).astype(jnp.float32)
        res_p = _pad2(res, (C8, Mp))
        kernel = _bn_res_relu_kernel
        inputs = (y_p, res_p, scale, shift)
        in_specs = [pl.BlockSpec((C8, tm), lambda i: (0, i)),
                    pl.BlockSpec((C8, tm), lambda i: (0, i)),
                    pl.BlockSpec((C8, 1), lambda i: (0, 0)),
                    pl.BlockSpec((C8, 1), lambda i: (0, 0))]
    else:
        kernel = _bn_relu_kernel
        inputs = (y_p, scale, shift)
        in_specs = [pl.BlockSpec((C8, tm), lambda i: (0, i)),
                    pl.BlockSpec((C8, 1), lambda i: (0, 0)),
                    pl.BlockSpec((C8, 1), lambda i: (0, 0))]

    out_p = pl.pallas_call(
        kernel,
        out_shape=jax.ShapeDtypeStruct((C8, Mp), jnp.float32),
        grid_spec=pltpu.PrefetchScalarGridSpec(
            num_scalar_prefetch=0, grid=(nm,),
            in_specs=in_specs,
            out_specs=pl.BlockSpec((C8, tm), lambda i: (0, i))),
        compiler_params=cparams2,
    )(*inputs)

    out = out_p[:Cout, :M].reshape(Cout, N, OD, OH, OW)
    return out.transpose(1, 0, 2, 3, 4)                  # back to NCDHW


# ------------------------------- reference --------------------------------- #

def reference(x, w, b, gamma, beta, *, stride, padding, residual, eps=1e-5):
    stride, padding = _triple(stride), _triple(padding)
    y = lax.conv_general_dilated(
        x.astype(jnp.float32), w.astype(jnp.float32),
        window_strides=stride,
        padding=[(padding[0], padding[0]), (padding[1], padding[1]),
                 (padding[2], padding[2])],
        dimension_numbers=("NCDHW", "OIDHW", "NCDHW"))
    y = y + b[None, :, None, None, None]
    mean = y.mean(axis=(0, 2, 3, 4), keepdims=True)
    var = y.var(axis=(0, 2, 3, 4), keepdims=True)   # biased, as BN training
    yn = (y - mean) / jnp.sqrt(var + eps)
    yn = yn * gamma[None, :, None, None, None] + beta[None, :, None, None, None]
    if residual:
        yn = yn + x
    return jnp.maximum(yn, 0.0)


# ---------------------------------- main ------------------------------------ #

if __name__ == "__main__":
    key = jax.random.PRNGKey(0)

    def run_case(key, *, N, Cin, Cout, D, ks, stride, padding, residual):
        k1, k2, k3 = jax.random.split(key, 3)
        x = jax.random.normal(k1, (N, Cin, D, D, D), jnp.float32)
        w = jax.random.normal(k2, (Cout, Cin, ks, ks, ks), jnp.float32) * 0.1
        b = jax.random.normal(k3, (Cout,), jnp.float32) * 0.1
        gamma = jnp.ones((Cout,), jnp.float32)   # BatchNorm3d default init
        beta = jnp.zeros((Cout,), jnp.float32)

        got = conv3d_block(x, w, b, gamma, beta, stride=stride,
                           padding=padding, residual=residual)
        got = jax.block_until_ready(got)
        want = reference(x, w, b, gamma, beta, stride=stride,
                         padding=padding, residual=residual)
        assert got.shape == want.shape, (got.shape, want.shape)
        # bf16 MXU operands + bf16 intermediate -> ~1e-2 worst-case error vs f32 ref
        assert jnp.allclose(got, want, atol=2e-2, rtol=2e-2), \
            float(jnp.max(jnp.abs(got - want)))

    ka, kb = jax.random.split(key)
    # residual block: in_channels == out_channels, shape preserving
    run_case(ka, N=2, Cin=8, Cout=8, D=8, ks=3, stride=1, padding=1,
             residual=True)
    # plain block: channel change + stride 2
    run_case(kb, N=2, Cin=4, Cout=16, D=8, ks=3, stride=2, padding=1,
             residual=False)

    print("KERNEL_OK")
</pallas_src>

<mosaic_0001>
module attributes {stable_mosaic.version = 11 : i64} {
  func.func @_conv_mm_kernel(%arg0: i32, %arg1: i32, %arg2: memref<8x256xbf16, #tpu.memory_space<vmem>>, %arg3: memref<256x512xbf16, #tpu.memory_space<vmem>>, %arg4: memref<8x512xbf16, #tpu.memory_space<vmem>>, %arg5: memref<8x128xf32, #tpu.memory_space<vmem>>, %arg6: memref<8x128xf32, #tpu.memory_space<vmem>>, %arg7: memref<8x512xf32, #tpu.memory_space<vmem>>) attributes {dimension_semantics = [#tpu.dimension_semantics<parallel>, #tpu.dimension_semantics<arbitrary>], iteration_bounds = array<i64: 2, 1>, scalar_prefetch = 0 : i64, scratch_operands = 1 : i64, tpu.core_type = #tpu.core_type<tc>, window_params = [{transform_indices = @transform_0, window_bounds = array<i64: 8, 256>}, {transform_indices = @transform_1, window_bounds = array<i64: 256, 512>}, {transform_indices = @transform_2, window_bounds = array<i64: 8, 512>}, {transform_indices = @transform_3, window_bounds = array<i64: 8, 128>}, {transform_indices = @transform_4, window_bounds = array<i64: 8, 128>}]} {
    %c0_i32 = arith.constant 0 : i32
    %0 = arith.cmpi eq, %arg1, %c0_i32 : i32
    %1 = arith.extui %0 : i1 to i32
    %c0_i32_0 = arith.constant 0 : i32
    %2 = arith.cmpi ne, %1, %c0_i32_0 : i32
    scf.if %2 {
      %cst_10 = arith.constant 0.000000e+00 : f32
      %12 = vector.broadcast %cst_10 : f32 to vector<8x512xf32>
      %c0_11 = arith.constant 0 : index
      %c0_12 = arith.constant 0 : index
      %13 = vector.load %arg7[%c0_11, %c0_12] : memref<8x512xf32, #tpu.memory_space<vmem>>, vector<8x512xf32>
      tpu.vector_store %arg7[%c0_11, %c0_12], %12 {strides = array<i32>} : memref<8x512xf32, #tpu.memory_space<vmem>>, vector<8x512xf32>,
    } else {
    }
    %c0 = arith.constant 0 : index
    %c0_1 = arith.constant 0 : index
    %3 = vector.load %arg7[%c0, %c0_1] : memref<8x512xf32, #tpu.memory_space<vmem>>, vector<8x512xf32>
    %c0_2 = arith.constant 0 : index
    %c0_3 = arith.constant 0 : index
    %4 = vector.load %arg2[%c0_2, %c0_3] : memref<8x256xbf16, #tpu.memory_space<vmem>>, vector<8x256xbf16>
    %c0_4 = arith.constant 0 : index
    %c0_5 = arith.constant 0 : index
    %5 = vector.load %arg3[%c0_4, %c0_5] : memref<256x512xbf16, #tpu.memory_space<vmem>>, vector<256x512xbf16>
    %cst = arith.constant dense<0.000000e+00> : vector<8x512xf32>
    %6 = tpu.matmul %4, %5, %cst {dimension_numbers = #tpu.dot_dimension_numbers<[1], [0], [0], [1], [0, 0, 1, 1], [], []>} : vector<8x256xbf16>, vector<256x512xbf16>, vector<8x512xf32> -> vector<8x512xf32>
    %7 = arith.addf %3, %6 : vector<8x512xf32>
    %c0_6 = arith.constant 0 : index
    %c0_7 = arith.constant 0 : index
    %8 = vector.load %arg7[%c0_6, %c0_7] : memref<8x512xf32, #tpu.memory_space<vmem>>, vector<8x512xf32>
    tpu.vector_store %arg7[%c0_6, %c0_7], %7 {strides = array<i32>} : memref<8x512xf32, #tpu.memory_space<vmem>>, vector<8x512xf32>,
    %c0_i32_8 = arith.constant 0 : i32
    %9 = arith.cmpi eq, %arg1, %c0_i32_8 : i32
    %10 = arith.extui %9 : i1 to i32
    %c0_i32_9 = arith.constant 0 : i32
    %11 = arith.cmpi ne, %10, %c0_i32_9 : i32
    scf.if %11 {
      %c0_10 = arith.constant 0 : index
      %c0_11 = arith.constant 0 : index
      %12 = vector.load %arg7[%c0_10, %c0_11] : memref<8x512xf32, #tpu.memory_space<vmem>>, vector<8x512xf32>
      %13 = arith.truncf %12 : vector<8x512xf32> to vector<8x512xbf16>
      %c0_12 = arith.constant 0 : index
      %c0_13 = arith.constant 0 : index
      %14 = vector.load %arg4[%c0_12, %c0_13] : memref<8x512xbf16, #tpu.memory_space<vmem>>, vector<8x512xbf16>
      tpu.vector_store %arg4[%c0_12, %c0_13], %13 {strides = array<i32>} : memref<8x512xbf16, #tpu.memory_space<vmem>>, vector<8x512xbf16>,
      %15 = vector.extract_strided_slice %12 {offsets = [0, 0], sizes = [8, 128], strides = [1, 1]} : vector<8x512xf32> to vector<8x128xf32>
      %16 = vector.extract_strided_slice %12 {offsets = [0, 128], sizes = [8, 128], strides = [1, 1]} : vector<8x512xf32> to vector<8x128xf32>
      %17 = arith.addf %15, %16 : vector<8x128xf32>
      %18 = vector.extract_strided_slice %12 {offsets = [0, 256], sizes = [8, 128], strides = [1, 1]} : vector<8x512xf32> to vector<8x128xf32>
      %19 = arith.addf %17, %18 : vector<8x128xf32>
      %20 = vector.extract_strided_slice %12 {offsets = [0, 384], sizes = [8, 128], strides = [1, 1]} : vector<8x512xf32> to vector<8x128xf32>
      %21 = arith.addf %19, %20 : vector<8x128xf32>
      %c0_14 = arith.constant 0 : index
      %c0_15 = arith.constant 0 : index
      %22 = vector.load %arg5[%c0_14, %c0_15] : memref<8x128xf32, #tpu.memory_space<vmem>>, vector<8x128xf32>
      tpu.vector_store %arg5[%c0_14, %c0_15], %21 {strides = array<i32>} : memref<8x128xf32, #tpu.memory_space<vmem>>, vector<8x128xf32>,
      %23 = arith.mulf %12, %12 : vector<8x512xf32>
      %24 = vector.extract_strided_slice %23 {offsets = [0, 0], sizes = [8, 128], strides = [1, 1]} : vector<8x512xf32> to vector<8x128xf32>
      %25 = vector.extract_strided_slice %23 {offsets = [0, 128], sizes = [8, 128], strides = [1, 1]} : vector<8x512xf32> to vector<8x128xf32>
      %26 = arith.addf %24, %25 : vector<8x128xf32>
      %27 = vector.extract_strided_slice %23 {offsets = [0, 256], sizes = [8, 128], strides = [1, 1]} : vector<8x512xf32> to vector<8x128xf32>
      %28 = arith.addf %26, %27 : vector<8x128xf32>
      %29 = vector.extract_strided_slice %23 {offsets = [0, 384], sizes = [8, 128], strides = [1, 1]} : vector<8x512xf32> to vector<8x128xf32>
      %30 = arith.addf %28, %29 : vector<8x128xf32>
      %c0_16 = arith.constant 0 : index
      %c0_17 = arith.constant 0 : index
      %31 = vector.load %arg6[%c0_16, %c0_17] : memref<8x128xf32, #tpu.memory_space<vmem>>, vector<8x128xf32>
      tpu.vector_store %arg6[%c0_16, %c0_17], %30 {strides = array<i32>} : memref<8x128xf32, #tpu.memory_space<vmem>>, vector<8x128xf32>,
    } else {
    }
    return
  }
  func.func @transform_0(%arg0: i32, %arg1: i32) -> (i32, i32) {
    %c0_i32 = arith.constant 0 : i32
    %c0_i32_0 = arith.constant 0 : i32
    return %c0_i32, %arg1 : i32, i32
  }
  func.func @transform_1(%arg0: i32, %arg1: i32) -> (i32, i32) {
    %c0_i32 = arith.constant 0 : i32
    return %arg1, %arg0 : i32, i32
  }
  func.func @transform_2(%arg0: i32, %arg1: i32) -> (i32, i32) {
    %c0_i32 = arith.constant 0 : i32
    %c0_i32_0 = arith.constant 0 : i32
    return %c0_i32, %arg0 : i32, i32
  }
  func.func @transform_3(%arg0: i32, %arg1: i32) -> (i32, i32) {
    %c0_i32 = arith.constant 0 : i32
    %c0_i32_0 = arith.constant 0 : i32
    return %c0_i32, %arg0 : i32, i32
  }
  func.func @transform_4(%arg0: i32, %arg1: i32) -> (i32, i32) {
    %c0_i32 = arith.constant 0 : i32
    %c0_i32_0 = arith.constant 0 : i32
    return %c0_i32, %arg0 : i32, i32
  }
}

</mosaic_0001>

<bundles_post_ra>
// kernel: tpu_custom_call.1
= control target key start
LH: loop header
LB: loop body
LE: loop exit
PB: predicated region body
PF: predicated region fallthrough
CT: control target
= control target key end

     0   :  { %s2055_s0 = inlined_call_operand.hbm [shape: bf16[8,256], index: 0, kind: input, shape index: {}]   ;;  %s2056_s1 = inlined_call_operand.hbm [shape: bf16[256,1024], index: 1, kind: input, shape index: {}]   ;;  %s2057_s2 = inlined_call_operand.hbm [shape: bf16[8,1024], index: 2, kind: output, shape index: {0}]   ;;  %s2058_s3 = inlined_call_operand.hbm [shape: f32[8,256], index: 3, kind: output, shape index: {1}]   ;;  %s2059_s4 = inlined_call_operand.hbm [shape: f32[8,256], index: 4, kind: output, shape index: {2}]  }
   0x1   :  { %2064 = sst [smem:[#allocation18_spill]] %s2055_s0 }
   0x2   :  { %10 = vsyncpa [#allocation4], 0 }
   0x3   :  { %11 = vsyncpa [#allocation7], 0 }
   0x4   :  { %13 = vsyncpa [#allocation7 + $0x1], 0 }
   0x5   :  { %14 = vsyncpa [#allocation5], 0 }
   0x6   :  { %16 = vsyncpa [#allocation5 + $0x1], 0 }
   0x7   :  { %17 = vsyncpa [#allocation10], 0 }
   0x8   :  { %19 = vsyncpa [#allocation10 + $0x1], 0  ;;  %s1700_s15 = smov 0   ;;  %s1702_s16 = smov 0  }
   0x9   :  { %s1704_s17 = smov 0   ;;  %s1706_s18 = smov 0  }
   0xa   :  { %s1708_s19 = smov 0   ;;  %s1710_s20 = smov 0  }
   0xb LB: > { %2065 = sst [smem:[#allocation16_spill]] %s1669_s20  ;;  %s1731_s21 = sadd.s32 4294967295, %s1669_s20   ;;  %s1669_s20 = sphi %s1710_s20, %s25_s20   ;;  %s1665_s19 = sphi %s1708_s19, %s2081_s19   ;;  %s1661_s18 = sphi %s1706_s18, %s2080_s18   ;;  %s1657_s17 = sphi %s1704_s17, %s2079_s17   ;;  %s1653_s16 = sphi %s1702_s16, %s2078_s16   ;;  %s1649_s15 = sphi %s1700_s15, %s2077_s15  }
   0xc   : > { %s2060_s22 = sadd.s32 4294967294, %s1669_s20   ;;  %s72_s23 = sadd.s32 1, %s1657_s17 }
   0xd   : > { %p79_p0 = scmp.ne.s32.totalorder %s1657_s17, %s1653_s16  ;;  %p80_p1 = scmp.eq.s32.totalorder %s1669_s20, 0 }
   0xe   : > { %p85_p2 = scmp.ne.s32.totalorder %s1653_s16, %s1649_s15  ;;  %p86_p3 = scmp.eq.s32.totalorder %s1731_s21, 0 }
   0xf   : > { %p109_p4 = scmp.eq.s32.totalorder %s1731_s21, 1  ;;  %p1742_p5 = por %p80_p1, %p79_p0 }
  0x10   : > { %p115_p6 = scmp.eq.s32.totalorder %s2060_s22, 1  ;;  %p1750_p7 = por %p86_p3, %p85_p2 }
  0x11   : > { %p1754_p8 = por %p109_p4, %p79_p0  ;;  %p1034_p10 = scmp.ge.s32.totalorder %s1669_s20, 1 }
  0x12   : > { %p1758_p9 = por %p115_p6, %p85_p2  ;;  %p174_p11 = scmp.lt.s32.totalorder %s1669_s20, 3 }
  0x13   : > { %s2071_s0 = sld [smem:[#allocation18_spill]]  ;;  %s1671_s6 = smov [#allocation3]  }
  0x14   : > { %s2069_s27 = scalar_select %p1758_p9, 1, 0 }
  0x15   : > { %p1767_p12 = pnand %p1034_p10, %p174_p11  ;;  %s191_s7 = sshll.u32 %s1671_s6, 4  ;;  %s192_s7 = int_to_ptr.vmem [resolvable:$true] %s191_s7 }
  0x16   : > { %2070 = sst [smem:[#allocation17_spill]] %s2069_s27  ;;  %p1036_p13 = scmp.ge.s32.totalorder %s1669_s20, 2 }
  0x17   : > { %p1389_p0 = pneg %p1767_p12  ;;  %p1408_p1 = scmp.lt.s32.totalorder %s1669_s20, 2 }
  0x18   : > { %s37_s9 = sadd.s32 1, %s1665_s19  ;;  %s202_s10 = sand.u32 1, %s1657_s17  }
  0x19   : > { %s189_s30 = sshll.u32 %s2071_s0, 4  ;;  %p1390_p2 = pnand %p1389_p0, %p86_p3  ;;  %s190_s30 = int_to_ptr.hbm [resolvable:$true] %s189_s30 }
  0x1a   : > { %p1779_p4 = pnand %p1408_p1, %p1742_p5  ;;  %p39_p6 = scmp.ge.s32.totalorder %s37_s9, 2 }
  0x1b   : > { %1392 = dma.hbm_to_vmem [thread:$0]  (!%p1390_p2), %s190_s30, 128, %s192_s7, [#allocation4]  }
  0x1c   : > { %s2083_s9 = smov (%p39_p6, %s37_s9), 0  ;;  %s1037_s11 = sshll.u32 %s202_s10, 9 }
  0x1d   : > { %s68_s12 = ssub.s32 %s1665_s19, %s2083_s9  ;;  %s1311_s13 = sshll.u32 %s1665_s19, 4 }
  0x1e   : > { %p70_p10 = scmp.eq.s32.totalorder %s68_s12, 0  ;;  %s214_s24 = scalar_lea.hbm %s2056_s1, %s1311_s13 }
  0x1f   : > { %s206_s29 = scalar_lea.vmem [#allocation6], %s1037_s11  ;;  %s215_s0 = sshll.u32 %s214_s24, 4  ;;  %s216_s0 = int_to_ptr.hbm [resolvable:$true] %s215_s0 }
  0x20   : > { %s217_s6 = sshll.u32 %s206_s29, 4  ;;  %s203_s30 = scalar_lea.sflag [#allocation7], %s202_s10  ;;  %s218_s6 = int_to_ptr.vmem [resolvable:$true] %s217_s6 }
  0x21   : > { %s1796_s22 = scalar_select %p70_p10, %s1657_s17, %s72_s23  }
  0x22   : > { %s1672_s7 = smov 512   ;;  %s1673_s20 = smov 256  }
  0x23   : > { %s1674_s27 = smov 16   ;;  %229 = sbr.rel (%p1767_p12) target bundleno = 277 (0x115), region = 28 }
  0x24   : > { %1396 = dma.hbm_to_vmem [thread:$0]  (!%p1779_p4), %s216_s0, 8192, %s218_s6, %s203_s30, %s1672_s7, %s1673_s20, %s1674_s27  }
  0x28   : > { %1632 = dma.done.wait (%p86_p3), [#allocation4], 128  }
  0x29   : > { %1634 = vsyncadd (%p86_p3), [#allocation4], 4294967168  ;;  %s1807_s23 = sand.u32 1, %s1653_s16  }
  0x2a   : > { %s1042_s10 = sshll.u32 %s1807_s23, 9  ;;  %s237_s11 = scalar_lea.sflag [#allocation7], %s1807_s23 }
  0x2b   : > { %s1811_s12 = scalar_lea.vmem [#allocation6], %s1042_s10 }
  0x2c   : > { %1636 = dma.done.wait (%p1750_p7), %s237_s11, 8192  }
  0x2d   : > { %1638 = vsyncadd (%p1750_p7), %s237_s11, 4294959104  ;;  %v1160_v0 = vld [vmem:[%s1811_s12 + $0xe0] sm:$0xf]  ;;  %v1342_v1 = vld [vmem:[%s1811_s12 + $0xec] sm:$0xf0]  ;;  %s1043_s0 = sshll.u32 %s1807_s23, 4 }
  0x2e   : > { %v1288_v2 = vld [vmem:[%s1811_s12 + $0x1e0] sm:$0xf]  ;;  %v1161_v3 = vor.u32 %v1342_v1, %v1160_v0  ;;  %v1374_v4 = vld [vmem:[%s1811_s12 + $0x1ec] sm:$0xf0]  ;;  %v1340_v5 = vld [vmem:[%s1811_s12 + $0xe4] sm:$0xf] }
  0x2f   : > { %v1162_v6 = vld [vmem:[%s1811_s12 + $0xf0] sm:$0xf0]  ;;  %v1289_v7 = vor.u32 %v1374_v4, %v1288_v2  ;;  %v1372_v9 = vld [vmem:[%s1811_s12 + $0x1e4] sm:$0xf]  ;;  %v1144_v11 = vld [vmem:[%s1811_s12 + $0xc0] sm:$0xf] }
  0x30   : > { %v1165_v8 = vor.u32 %v1340_v5, %v1162_v6  ;;  %v1290_v10 = vld [vmem:[%s1811_s12 + $0x1f0] sm:$0xf0]  ;;  %684 = vmatpush.bf16.msra.mxu0 %v1161_v3  ;;  %v1338_v13 = vld [vmem:[%s1811_s12 + $0xcc] sm:$0xf0]  ;;  %v1272_v14 = vld [vmem:[%s1811_s12 + $0x1c0] sm:$0xf] }
  0x31   : > { %v1293_v12 = vor.u32 %v1372_v9, %v1290_v10  ;;  %v1370_v15 = vld [vmem:[%s1811_s12 + $0x1cc] sm:$0xf0]  ;;  %697 = vmatpush.bf16.msra.mxu1 %v1289_v7  ;;  %v1145_v16 = vor.u32 %v1338_v13, %v1144_v11  ;;  %v1336_v18 = vld [vmem:[%s1811_s12 + $0xc4] sm:$0xf]  ;;  %v1146_v19 = vld [vmem:[%s1811_s12 + $0xd0] sm:$0xf0] }
  0x32   : > { %710 = vmatpush.bf16.msra.mxu2 %v1165_v8  ;;  %v1273_v17 = vor.u32 %v1370_v15, %v1272_v14  ;;  %v1368_v20 = vld [vmem:[%s1811_s12 + $0x1c4] sm:$0xf]  ;;  %v1149_v21 = vor.u32 %v1336_v18, %v1146_v19  ;;  %v1274_v22 = vld [vmem:[%s1811_s12 + $0x1d0] sm:$0xf0]  ;;  %v1128_v23 = vld [vmem:[%s1811_s12 + $0xa0] sm:$0xf] }
  0x33   : > { %723 = vmatpush.bf16.msra.mxu3 %v1293_v12  ;;  %v1334_v24 = vld [vmem:[%s1811_s12 + $0xac] sm:$0xf0]  ;;  %v1277_v25 = vor.u32 %v1368_v20, %v1274_v22  ;;  %v1256_v26 = vld [vmem:[%s1811_s12 + $0x1a0] sm:$0xf]  ;;  %v1332_v28 = vld [vmem:[%s1811_s12 + $0xa4] sm:$0xf] }
  0x34   : > { %v1366_v27 = vld [vmem:[%s1811_s12 + $0x1ac] sm:$0xf0]  ;;  %685 = vmatpush.bf16.msra.mxu0 %v1145_v16  ;;  %v1129_v29 = vor.u32 %v1334_v24, %v1128_v23  ;;  %v1130_v30 = vld [vmem:[%s1811_s12 + $0xb0] sm:$0xf0]  ;;  %v1364_v31 = vld [vmem:[%s1811_s12 + $0x1a4] sm:$0xf] }
  0x35   : > { %v1258_v32 = vld [vmem:[%s1811_s12 + $0x1b0] sm:$0xf0]  ;;  %698 = vmatpush.bf16.msra.mxu1 %v1273_v17  ;;  %v1257_v33 = vor.u32 %v1366_v27, %v1256_v26  ;;  %v1133_v34 = vor.u32 %v1332_v28, %v1130_v30  ;;  %v1112_v35 = vld [vmem:[%s1811_s12 + $0x80] sm:$0xf]  ;;  %v1330_v36 = vld [vmem:[%s1811_s12 + $0x8c] sm:$0xf0] }
  0x36   : > { %711 = vmatpush.bf16.msra.mxu2 %v1149_v21  ;;  %v1240_v37 = vld [vmem:[%s1811_s12 + $0x180] sm:$0xf]  ;;  %v1261_v38 = vor.u32 %v1364_v31, %v1258_v32  ;;  %v1362_v39 = vld [vmem:[%s1811_s12 + $0x18c] sm:$0xf0]  ;;  %v1328_v40 = vld [vmem:[%s1811_s12 + $0x84] sm:$0xf]  ;;  %v1113_v44 = vor.u32 %v1330_v36, %v1112_v35 }
  0x37   : > { %724 = vmatpush.bf16.msra.mxu3 %v1277_v25  ;;  %v1114_v41 = vld [vmem:[%s1811_s12 + $0x90] sm:$0xf0]  ;;  %v1360_v42 = vld [vmem:[%s1811_s12 + $0x184] sm:$0xf]  ;;  %v1241_v45 = vor.u32 %v1362_v39, %v1240_v37  ;;  %v1096_v47 = vld [vmem:[%s1811_s12 + $0x60] sm:$0xf] }
  0x38   : > { %v1242_v43 = vld [vmem:[%s1811_s12 + $0x190] sm:$0xf0]  ;;  %686 = vmatpush.bf16.msra.mxu0 %v1129_v29  ;;  %v1117_v46 = vor.u32 %v1328_v40, %v1114_v41  ;;  %v1326_v48 = vld [vmem:[%s1811_s12 + $0x6c] sm:$0xf0]  ;;  %v1224_v49 = vld [vmem:[%s1811_s12 + $0x160] sm:$0xf] }
  0x39   : > { %699 = vmatpush.bf16.msra.mxu1 %v1257_v33  ;;  %v1245_v50 = vor.u32 %v1360_v42, %v1242_v43  ;;  %v1358_v51 = vld [vmem:[%s1811_s12 + $0x16c] sm:$0xf0]  ;;  %v1324_v52 = vld [vmem:[%s1811_s12 + $0x64] sm:$0xf]  ;;  %v1098_v53 = vld [vmem:[%s1811_s12 + $0x70] sm:$0xf0]  ;;  %v1097_v56 = vor.u32 %v1326_v48, %v1096_v47 }
  0x3a   : > { %712 = vmatpush.bf16.msra.mxu2 %v1133_v34  ;;  %v1356_v54 = vld [vmem:[%s1811_s12 + $0x164] sm:$0xf]  ;;  %v1226_v55 = vld [vmem:[%s1811_s12 + $0x170] sm:$0xf0]  ;;  %v1225_v57 = vor.u32 %v1358_v51, %v1224_v49  ;;  %v1101_v58 = vor.u32 %v1324_v52, %v1098_v53  ;;  %v1080_v59 = vld [vmem:[%s1811_s12 + $0x40] sm:$0xf] }
  0x3b   : > { %725 = vmatpush.bf16.msra.mxu3 %v1261_v38  ;;  %v1322_v60 = vld [vmem:[%s1811_s12 + $0x4c] sm:$0xf0]  ;;  %v1208_v61 = vld [vmem:[%s1811_s12 + $0x140] sm:$0xf]  ;;  %v1229_v62 = vor.u32 %v1356_v54, %v1226_v55  ;;  %v1320_v0 = vld [vmem:[%s1811_s12 + $0x44] sm:$0xf] }
  0x3c   : > { %687 = vmatpush.bf16.msra.mxu0 %v1113_v44  ;;  %v1354_v63 = vld [vmem:[%s1811_s12 + $0x14c] sm:$0xf0]  ;;  %v1082_v1 = vld [vmem:[%s1811_s12 + $0x50] sm:$0xf0]  ;;  %v1352_v2 = vld [vmem:[%s1811_s12 + $0x144] sm:$0xf]  ;;  %v1081_v4 = vor.u32 %v1322_v60, %v1080_v59 }
  0x3d   : > { %700 = vmatpush.bf16.msra.mxu1 %v1241_v45  ;;  %v1210_v3 = vld [vmem:[%s1811_s12 + $0x150] sm:$0xf0]  ;;  %v1209_v5 = vor.u32 %v1354_v63, %v1208_v61  ;;  %v1085_v6 = vor.u32 %v1320_v0, %v1082_v1  ;;  %v1064_v7 = vld [vmem:[%s1811_s12 + $0x20] sm:$0xf]  ;;  %v1318_v8 = vld [vmem:[%s1811_s12 + $0x2c] sm:$0xf0] }
  0x3e   : > { %713 = vmatpush.bf16.msra.mxu2 %v1117_v46  ;;  %v1192_v9 = vld [vmem:[%s1811_s12 + $0x120] sm:$0xf]  ;;  %v1213_v10 = vor.u32 %v1352_v2, %v1210_v3  ;;  %v1350_v11 = vld [vmem:[%s1811_s12 + $0x12c] sm:$0xf0]  ;;  %v1316_v12 = vld [vmem:[%s1811_s12 + $0x24] sm:$0xf]  ;;  %v1065_v16 = vor.u32 %v1318_v8, %v1064_v7 }
  0x3f   : > { %726 = vmatpush.bf16.msra.mxu3 %v1245_v50  ;;  %v1066_v13 = vld [vmem:[%s1811_s12 + $0x30] sm:$0xf0]  ;;  %v1348_v14 = vld [vmem:[%s1811_s12 + $0x124] sm:$0xf]  ;;  %v1048_v17 = vld [vmem:[%s1811_s12] sm:$0xf]  ;;  %v1193_v20 = vor.u32 %v1350_v11, %v1192_v9 }
  0x40   : > { %688 = vmatpush.bf16.msra.mxu0 %v1097_v56  ;;  %v1194_v15 = vld [vmem:[%s1811_s12 + $0x130] sm:$0xf0]  ;;  %v1314_v18 = vld [vmem:[%s1811_s12 + $0xc] sm:$0xf0]  ;;  %v1176_v19 = vld [vmem:[%s1811_s12 + $0x100] sm:$0xf]  ;;  %v1069_v21 = vor.u32 %v1316_v12, %v1066_v13 }
  0x41   : > { %701 = vmatpush.bf16.msra.mxu1 %v1225_v57  ;;  %v1346_v22 = vld [vmem:[%s1811_s12 + $0x10c] sm:$0xf0]  ;;  %v1312_v23 = vld [vmem:[%s1811_s12 + $0x4] sm:$0xf]  ;;  %v1050_v24 = vld [vmem:[%s1811_s12 + $0x10] sm:$0xf0]  ;;  %v1197_v25 = vor.u32 %v1348_v14, %v1194_v15  ;;  %v1049_v32 = vor.u32 %v1314_v18, %v1048_v17 }
  0x42   : > { %714 = vmatpush.bf16.msra.mxu2 %v1101_v58  ;;  %v1344_v26 = vld [vmem:[%s1811_s12 + $0x104] sm:$0xf]  ;;  %v1178_v27 = vld [vmem:[%s1811_s12 + $0x110] sm:$0xf0]  ;;  %v1168_v28 = vld [vmem:[%s1811_s12 + $0xe8] sm:$0xf]  ;;  %v1177_v37 = vor.u32 %v1346_v22, %v1176_v19  ;;  %v1053_v38 = vor.u32 %v1312_v23, %v1050_v24 }
  0x43   : > { %727 = vmatpush.bf16.msra.mxu3 %v1229_v62  ;;  %v1343_v29 = vld [vmem:[%s1811_s12 + $0xf4] sm:$0xf0]  ;;  %v1296_v30 = vld [vmem:[%s1811_s12 + $0x1e8] sm:$0xf]  ;;  %v1341_v34 = vld [vmem:[%s1811_s12 + $0xec] sm:$0xf]  ;;  %v1181_v42 = vor.u32 %v1344_v26, %v1178_v27 }
  0x44   : > { %689 = vmatpush.bf16.msra.mxu0 %v1081_v4  ;;  %v292_v31 = vld [vmem:[#allocation3] sm:$0xff]  ;;  %v1373_v39 = vld [vmem:[%s1811_s12 + $0x1ec] sm:$0xf]  ;;  %v1169_v43 = vor.u32 %v1343_v29, %v1168_v28  ;;  %v1152_v46 = vld [vmem:[%s1811_s12 + $0xc8] sm:$0xf]  ;;  %s1958_s20 = scalar_lea.vmem [#allocation8], %s1043_s0 }
  0x45   : > { %702 = vmatpush.bf16.msra.mxu1 %v1209_v5  ;;  %v1375_v33 = vld [vmem:[%s1811_s12 + $0x1f4] sm:$0xf0]  ;;  %v1170_v35 = vld [vmem:[%s1811_s12 + $0xf8] sm:$0xf0]  ;;  %v358_v36 = vunpack.c.l.b16 %v292_v31  ;;  %v359_v41 = vunpack.c.h.b16 %v292_v31  ;;  %v1280_v48 = vld [vmem:[%s1811_s12 + $0x1c8] sm:$0xf] }
  0x46   : > { %715 = vmatpush.bf16.msra.mxu2 %v1085_v6  ;;  %v1298_v40 = vld [vmem:[%s1811_s12 + $0x1f8] sm:$0xf0]  ;;  %v1297_v44 = vor.u32 %v1375_v33, %v1296_v30  ;;  %v1173_v45 = vor.u32 %v1341_v34, %v1170_v35  ;;  %v1339_v47 = vld [vmem:[%s1811_s12 + $0xd4] sm:$0xf0]  ;;  %v1337_v51 = vld [vmem:[%s1811_s12 + $0xcc] sm:$0xf] }
  0x47   : > { %728 = vmatpush.bf16.msra.mxu3 %v1213_v10  ;;  %v1301_v49 = vor.u32 %v1373_v39, %v1298_v40  ;;  %v1371_v50 = vld [vmem:[%s1811_s12 + $0x1d4] sm:$0xf0]  ;;  %v1154_v52 = vld [vmem:[%s1811_s12 + $0xd8] sm:$0xf0]  ;;  %v1895_v53 = vpack.c.b16 %v358_v36, %v358_v36  ;;  %v1369_v54 = vld [vmem:[%s1811_s12 + $0x1cc] sm:$0xf]  ;;  %v1899_v56 = vpack.c.b16 %v359_v41, %v359_v41  ;;  %v1153_v57 = vor.u32 %v1339_v47, %v1152_v46 }
  0x48   : > { %690 = vmatpush.bf16.msra.mxu0 %v1065_v16  ;;  %v1282_v55 = vld [vmem:[%s1811_s12 + $0x1d8] sm:$0xf0]  ;;  %v1281_v58 = vor.u32 %v1371_v50, %v1280_v48  ;;  %v1157_v59 = vor.u32 %v1337_v51, %v1154_v52  ;;  %v1136_v60 = vld [vmem:[%s1811_s12 + $0xa8] sm:$0xf]  ;;  %v1335_v61 = vld [vmem:[%s1811_s12 + $0xb4] sm:$0xf0] }
  0x49   : > { %703 = vmatpush.bf16.msra.mxu1 %v1193_v20  ;;  %v1264_v62 = vld [vmem:[%s1811_s12 + $0x1a8] sm:$0xf]  ;;  %v1285_v63 = vor.u32 %v1369_v54, %v1282_v55  ;;  %v1367_v0 = vld [vmem:[%s1811_s12 + $0x1b4] sm:$0xf0]  ;;  %v1333_v1 = vld [vmem:[%s1811_s12 + $0xac] sm:$0xf]  ;;  %v1137_v5 = vor.u32 %v1335_v61, %v1136_v60 }
  0x4a   : > { %716 = vmatpush.bf16.msra.mxu2 %v1069_v21  ;;  %v1138_v2 = vld [vmem:[%s1811_s12 + $0xb8] sm:$0xf0]  ;;  %v1365_v3 = vld [vmem:[%s1811_s12 + $0x1ac] sm:$0xf]  ;;  %v1265_v6 = vor.u32 %v1367_v0, %v1264_v62  ;;  %v1120_v8 = vld [vmem:[%s1811_s12 + $0x88] sm:$0xf] }
  0x4b   : > { %729 = vmatpush.bf16.msra.mxu3 %v1197_v25  ;;  %v1266_v4 = vld [vmem:[%s1811_s12 + $0x1b8] sm:$0xf0]  ;;  %v1141_v7 = vor.u32 %v1333_v1, %v1138_v2  ;;  %v1331_v9 = vld [vmem:[%s1811_s12 + $0x94] sm:$0xf0]  ;;  %v1248_v10 = vld [vmem:[%s1811_s12 + $0x188] sm:$0xf] }
  0x4c   : > { %691 = vmatpush.bf16.msra.mxu0 %v1049_v32  ;;  %v1269_v11 = vor.u32 %v1365_v3, %v1266_v4  ;;  %v1363_v12 = vld [vmem:[%s1811_s12 + $0x194] sm:$0xf0]  ;;  %v1329_v13 = vld [vmem:[%s1811_s12 + $0x8c] sm:$0xf]  ;;  %v1122_v14 = vld [vmem:[%s1811_s12 + $0x98] sm:$0xf0]  ;;  %v1121_v17 = vor.u32 %v1331_v9, %v1120_v8 }
  0x4d   : > { %704 = vmatpush.bf16.msra.mxu1 %v1177_v37  ;;  %v1361_v15 = vld [vmem:[%s1811_s12 + $0x18c] sm:$0xf]  ;;  %v1250_v16 = vld [vmem:[%s1811_s12 + $0x198] sm:$0xf0]  ;;  %v1249_v18 = vor.u32 %v1363_v12, %v1248_v10  ;;  %v1125_v19 = vor.u32 %v1329_v13, %v1122_v14  ;;  %v1104_v20 = vld [vmem:[%s1811_s12 + $0x68] sm:$0xf] }
  0x4e   : > { %717 = vmatpush.bf16.msra.mxu2 %v1053_v38  ;;  %v1327_v21 = vld [vmem:[%s1811_s12 + $0x74] sm:$0xf0]  ;;  %v1232_v22 = vld [vmem:[%s1811_s12 + $0x168] sm:$0xf]  ;;  %v1253_v23 = vor.u32 %v1361_v15, %v1250_v16  ;;  %v1325_v25 = vld [vmem:[%s1811_s12 + $0x6c] sm:$0xf] }
  0x4f   : > { %730 = vmatpush.bf16.msra.mxu3 %v1181_v42  ;;  %692 = vmatmul.bf16.vlgmr.msra.gmra.mxu0 %v1895_v53  ;;  %v1359_v24 = vld [vmem:[%s1811_s12 + $0x174] sm:$0xf0]  ;;  %v1106_v26 = vld [vmem:[%s1811_s12 + $0x78] sm:$0xf0]  ;;  %v1357_v27 = vld [vmem:[%s1811_s12 + $0x16c] sm:$0xf]  ;;  %v1105_v29 = vor.u32 %v1327_v21, %v1104_v20 }
  0x50   : > { %736 = vmatpush.bf16.msrb.mxu0 %v1169_v43  ;;  %705 = vmatmul.bf16.vlgmr.msra.gmra.mxu1 %v1899_v56  ;;  %v1234_v28 = vld [vmem:[%s1811_s12 + $0x178] sm:$0xf0]  ;;  %v1233_v30 = vor.u32 %v1359_v24, %v1232_v22  ;;  %v1109_v31 = vor.u32 %v1325_v25, %v1106_v26  ;;  %v1088_v32 = vld [vmem:[%s1811_s12 + $0x48] sm:$0xf]  ;;  %v1323_v33 = vld [vmem:[%s1811_s12 + $0x54] sm:$0xf0] }
  0x51   : > { %749 = vmatpush.bf16.msrb.mxu1 %v1297_v44  ;;  %718 = vmatmul.bf16.vlgmr.msra.gmra.mxu2 %v1895_v53  ;;  %v1216_v34 = vld [vmem:[%s1811_s12 + $0x148] sm:$0xf]  ;;  %v1237_v35 = vor.u32 %v1357_v27, %v1234_v28  ;;  %v1355_v36 = vld [vmem:[%s1811_s12 + $0x154] sm:$0xf0]  ;;  %v1321_v37 = vld [vmem:[%s1811_s12 + $0x4c] sm:$0xf]  ;;  %v1089_v41 = vor.u32 %v1323_v33, %v1088_v32 }
  0x52   : > { %762 = vmatpush.bf16.msrb.mxu2 %v1173_v45  ;;  %731 = vmatmul.bf16.vlgmr.msra.gmra.mxu3 %v1899_v56  ;;  %v1090_v38 = vld [vmem:[%s1811_s12 + $0x58] sm:$0xf0]  ;;  %v1353_v39 = vld [vmem:[%s1811_s12 + $0x14c] sm:$0xf]  ;;  %v1217_v42 = vor.u32 %v1355_v36, %v1216_v34  ;;  %v1072_v44 = vld [vmem:[%s1811_s12 + $0x28] sm:$0xf] }
  0x53   : > { %775 = vmatpush.bf16.msrb.mxu3 %v1301_v49  ;;  %v1218_v40 = vld [vmem:[%s1811_s12 + $0x158] sm:$0xf0]  ;;  %v1093_v43 = vor.u32 %v1321_v37, %v1090_v38  ;;  %v1319_v45 = vld [vmem:[%s1811_s12 + $0x34] sm:$0xf0]  ;;  %v1200_v46 = vld [vmem:[%s1811_s12 + $0x128] sm:$0xf] }
  0x54   : > { %737 = vmatpush.bf16.msrb.mxu0 %v1153_v57  ;;  %v1221_v47 = vor.u32 %v1353_v39, %v1218_v40  ;;  %v1351_v48 = vld [vmem:[%s1811_s12 + $0x134] sm:$0xf0]  ;;  %v1317_v49 = vld [vmem:[%s1811_s12 + $0x2c] sm:$0xf]  ;;  %v1074_v50 = vld [vmem:[%s1811_s12 + $0x38] sm:$0xf0]  ;;  %v1073_v54 = vor.u32 %v1319_v45, %v1072_v44 }
  0x55   : > { %750 = vmatpush.bf16.msrb.mxu1 %v1281_v58  ;;  %v1349_v51 = vld [vmem:[%s1811_s12 + $0x12c] sm:$0xf]  ;;  %v1202_v52 = vld [vmem:[%s1811_s12 + $0x138] sm:$0xf0]  ;;  %v1201_v55 = vor.u32 %v1351_v48, %v1200_v46  ;;  %v1077_v57 = vor.u32 %v1317_v49, %v1074_v50  ;;  %v1056_v58 = vld [vmem:[%s1811_s12 + $0x8] sm:$0xf] }
  0x56   : > { %763 = vmatpush.bf16.msrb.mxu2 %v1157_v59  ;;  %v1315_v59 = vld [vmem:[%s1811_s12 + $0x14] sm:$0xf0]  ;;  %v1184_v60 = vld [vmem:[%s1811_s12 + $0x108] sm:$0xf]  ;;  %v1205_v61 = vor.u32 %v1349_v51, %v1202_v52  ;;  %v1058_v0 = vld [vmem:[%s1811_s12 + $0x18] sm:$0xf0] }
  0x57   : > { %776 = vmatpush.bf16.msrb.mxu3 %v1285_v63  ;;  %v1347_v62 = vld [vmem:[%s1811_s12 + $0x114] sm:$0xf0]  ;;  %v1313_v63 = vld [vmem:[%s1811_s12 + $0xc] sm:$0xf]  ;;  %v1186_v2 = vld [vmem:[%s1811_s12 + $0x118] sm:$0xf0]  ;;  %v1057_v3 = vor.u32 %v1315_v59, %v1056_v58 }
  0x58   : > { %738 = vmatpush.bf16.msrb.mxu0 %v1137_v5  ;;  %v1345_v1 = vld [vmem:[%s1811_s12 + $0x10c] sm:$0xf]  ;;  %v1185_v4 = vor.u32 %v1347_v62, %v1184_v60  ;;  %v1061_v5 = vor.u32 %v1313_v63, %v1058_v0  ;;  %s1044_s25 = sshll.u32 %s1807_s23, 3  ;;  %s1307_s27 = sshll.u32 %s1661_s18, 3 }
  0x59   : > { %751 = vmatpush.bf16.msrb.mxu1 %v1265_v6  ;;  %v1189_v6 = vor.u32 %v1345_v1, %v1186_v2  ;;  %s1376_s5 = sshll.u32 %s1661_s18, 4  ;;  %s824_s8 = sand.u32 1, %s1731_s21  }
  0x5a   : > { %764 = vmatpush.bf16.msrb.mxu2 %v1141_v7  ;;  %s855_s28 = scalar_lea.hbm %s2058_s3, %s1307_s27  ;;  %s268_s24 = scalar_lea.vmem [#allocation9], %s1044_s25 }
  0x5b   : > { %777 = vmatpush.bf16.msrb.mxu3 %v1269_v11  ;;  %s857_s29 = sshll.u32 %s268_s24, 4  ;;  %s841_s7 = scalar_lea.hbm %s2057_s2, %s1376_s5  ;;  %s1974_s29 = int_to_ptr.vmem [resolvable:$true] %s857_s29 }
  0x5c   : > { %739 = vmatpush.bf16.msrb.mxu0 %v1121_v17  ;;  %s869_s18 = scalar_lea.hbm %s2059_s4, %s1307_s27  ;;  %s859_s12 = sshll.u32 %s855_s28, 4  ;;  %s860_s12 = int_to_ptr.hbm [resolvable:$true] %s859_s12 }
  0x5d   : > { %752 = vmatpush.bf16.msrb.mxu1 %v1249_v18  ;;  %s843_s0 = sshll.u32 %s1958_s20, 4  ;;  %s845_s13 = sshll.u32 %s841_s7, 4  ;;  %s1977_s0 = int_to_ptr.vmem [resolvable:$true] %s843_s0  ;;  %s1979_s13 = int_to_ptr.hbm [resolvable:$true] %s845_s13 }
  0x5e   : > { %765 = vmatpush.bf16.msrb.mxu2 %v1125_v19  ;;  %s873_s5 = sshll.u32 %s869_s18, 4  ;;  %s275_s14 = scalar_lea.vmem [#allocation11], %s1044_s25  ;;  %s1983_s5 = int_to_ptr.hbm [resolvable:$true] %s873_s5 }
  0x5f   : > { %778 = vmatpush.bf16.msrb.mxu3 %v1253_v23  ;;  %s871_s6 = sshll.u32 %s275_s14, 4  ;;  %s1987_s27 = scalar_lea.sflag [#allocation10], %s824_s8  ;;  %s1981_s6 = int_to_ptr.vmem [resolvable:$true] %s871_s6 }
  0x60   : > { %740 = vmatpush.bf16.msrb.mxu0 %v1105_v29  ;;  %s1537_s25 = sshra.s32 %s860_s12, 4  ;;  %s1543_s10 = scalar_lea.hbm %s2058_s3, 16  ;;  %s1538_s25 = int_to_ptr.hbm [resolvable:$true] %s1537_s25 }
  0x61   : > { %753 = vmatpush.bf16.msrb.mxu1 %v1233_v30  ;;  %s1539_s28 = scalar_lea.hbm %s1538_s25, 8  ;;  %p1544_p11 = scmp.lt.s32.totalorder %s1538_s25, %s2058_s3 }
  0x62   : > { %766 = vmatpush.bf16.msrb.mxu2 %v1109_v31  ;;  %p1540_p3 = scmp.ne.s32.totalorder %s1538_s25, %s1539_s28  ;;  %p1545_p12 = scmp.lt.s32.totalorder %s1543_s10, %s1539_s28 }
  0x63   : > { %779 = vmatpush.bf16.msrb.mxu3 %v1237_v35 }
  0x64   : > { %741 = vmatpush.bf16.msrb.mxu0 %v1089_v41  ;;  %p1541_p5 = pnand %p1540_p3, %p1754_p8  ;;  %p1546_p0 = por %p1545_p12, %p1544_p11 }
  0x65   : > { %754 = vmatpush.bf16.msrb.mxu1 %v1217_v42 }
  0x66   : > { %767 = vmatpush.bf16.msrb.mxu2 %v1093_v43  ;;  %p1542_p7 = pneg %p1541_p5 }
  0x67   : > { %780 = vmatpush.bf16.msrb.mxu3 %v1221_v47 }
  0x68   : > { %742 = vmatpush.bf16.msrb.mxu0 %v1073_v54  ;;  %p1547_p1 = pnand %p1546_p0, %p1542_p7 }
  0x69   : > { %755 = vmatpush.bf16.msrb.mxu1 %v1201_v55 }
  0x6a   : > { %768 = vmatpush.bf16.msrb.mxu2 %v1077_v57 }
  0x6b   : > { %781 = vmatpush.bf16.msrb.mxu3 %v1205_v61 }
  0x6c   : > { %743 = vmatpush.bf16.msrb.mxu0 %v1057_v3 }
  0x6d   : > { %756 = vmatpush.bf16.msrb.mxu1 %v1185_v4 }
  0x6e   : > { %769 = vmatpush.bf16.msrb.mxu2 %v1061_v5 }
  0x6f   : > { %782 = vmatpush.bf16.msrb.mxu3 %v1189_v6  ;;  %744 = vmatmul.bf16.vlgmr.msrb.gmra.mxu0 %v1895_v53 }
  0x70   : > { %757 = vmatmul.bf16.vlgmr.msrb.gmra.mxu1 %v1899_v56 }
  0x71   : > { %770 = vmatmul.bf16.vlgmr.msrb.gmra.mxu2 %v1895_v53 }
  0x72   : > { %783 = vmatmul.bf16.vlgmr.msrb.gmra.mxu3 %v1899_v56 }
  0xcc   : > { %v693_v7 = vpop.f32.mrf.mxu0 }
  0xcd   : > { %v706_v8 = vpop.f32.mrf.mxu1 }
  0xce   : > { %v707_v9 = vadd.f32 %v706_v8, %v693_v7 }
  0xd0   : > { %v811_v19 = vmul.f32 %v707_v9, %v707_v9 }
  0xd4   : > { %v719_v10 = vpop.f32.mrf.mxu2  ;;  %v695_v13 = vpop.f32.mrf.mxu0 }
  0xd5   : > { %v732_v11 = vpop.f32.mrf.mxu3  ;;  %v708_v15 = vpop.f32.mrf.mxu1 }
  0xd6   : > { %v733_v12 = vadd.f32 %v732_v11, %v719_v10 }
  0xd8   : > { %v803_v14 = vpack.c.bf16 %v733_v12, %v707_v9  ;;  %v812_v20 = vmul.f32 %v733_v12, %v733_v12  ;;  %v807_v21 = vadd.f32 %v733_v12, %v707_v9 }
  0xda   : > { %805 = vst [vmem:[%s1958_s20] sm:$0xff] %v803_v14  ;;  %v815_v26 = vadd.f32 %v812_v20, %v811_v19 }
  0xdc   : > { %v721_v53 = vpop.f32.mrf.mxu2 }
  0xdd   : > { %v734_v16 = vpop.f32.mrf.mxu3 }
  0xec   : > { %v745_v56 = vpop.f32.mrf.mxu0 }
  0xed   : > { %v758_v17 = vpop.f32.mrf.mxu1 }
  0xee   : > { %v759_v18 = vadd.f32 %v758_v17, %v745_v56 }
  0xf0   : > { %v813_v22 = vmul.f32 %v759_v18, %v759_v18  ;;  %v808_v27 = vadd.f32 %v807_v21, %v759_v18 }
  0xf2   : > { %v816_v30 = vadd.f32 %v815_v26, %v813_v22 }
  0xf4   : > { %v771_v23 = vpop.f32.mrf.mxu2  ;;  %v747_v25 = vpop.f32.mrf.mxu0 }
  0xf5   : > { %v784_v24 = vpop.f32.mrf.mxu3  ;;  %v760_v29 = vpop.f32.mrf.mxu1 }
  0xf6   : > { %v785_v28 = vadd.f32 %v784_v24, %v771_v23 }
  0xf8   : > { %v804_v31 = vpack.c.bf16 %v785_v28, %v759_v18  ;;  %v809_v32 = vadd.f32 %v808_v27, %v785_v28  ;;  %v814_v33 = vmul.f32 %v785_v28, %v785_v28 }
  0xfa   : > { %v817_v34 = vadd.f32 %v816_v30, %v814_v33  ;;  %810 = vst [vmem:[%s268_s24] sm:$0xff] %v809_v32 }
  0xfb   : > { %1550 = shalt.err (!%p1547_p1)
}
  0xfc   : > { %1384 = dma.vmem_to_hbm [thread:$0]  (%p1754_p8), %s1974_s29, 128, %s860_s12, %s1987_s27   ;;  %806 = vst [vmem:[%s1958_s20 + $0x8] sm:$0xff] %v804_v31  ;;  %v773_v35 = vpop.f32.mrf.mxu2 }
  0xfd   : > { %818 = vst [vmem:[%s275_s14] sm:$0xff] %v817_v34  ;;  %s820_s21 = scalar_lea.sflag [#allocation5], %s1807_s23  ;;  %s1565_s8 = sshra.s32 %s1979_s13, 4  ;;  %s1566_s8 = int_to_ptr.hbm [resolvable:$true] %s1565_s8 }
  0xfe   : > { %s1567_s18 = scalar_lea.hbm %s1566_s8, 16  ;;  %s1571_s30 = scalar_lea.hbm %s2057_s2, 32 }
  0xff   : > { %p1568_p2 = scmp.ne.s32.totalorder %s1566_s8, %s1567_s18  ;;  %p1572_p10 = scmp.lt.s32.totalorder %s1566_s8, %s2057_s2 }
 0x100   : > { %p1573_p3 = scmp.lt.s32.totalorder %s1571_s30, %s1567_s18 }
 0x101   : > { %p1569_p4 = pnand %p1568_p2, %p1754_p8 }
 0x102   : > { %p1574_p5 = por %p1573_p3, %p1572_p10 }
 0x103   : > { %p1570_p6 = pneg %p1569_p4 }
 0x105   : > { %p1575_p7 = pnand %p1574_p5, %p1570_p6 }
 0x107   : > { %1578 = shalt.err (!%p1575_p7)
}
 0x108   : > { %1383 = dma.vmem_to_hbm [thread:$0]  (%p1754_p8), %s1977_s0, 256, %s1979_s13, %s820_s21   ;;  %v786_v36 = vpop.f32.mrf.mxu3 }
 0x109   : > { %s1593_s23 = sshra.s32 %s1983_s5, 4  ;;  %s1599_s14 = scalar_lea.hbm %s2059_s4, 16  ;;  %s1594_s23 = int_to_ptr.hbm [resolvable:$true] %s1593_s23 }
 0x10a   : > { %s1595_s20 = scalar_lea.hbm %s1594_s23, 8  ;;  %p1600_p1 = scmp.lt.s32.totalorder %s1594_s23, %s2059_s4 }
 0x10b   : > { %p1596_p11 = scmp.ne.s32.totalorder %s1594_s23, %s1595_s20  ;;  %p1601_p2 = scmp.lt.s32.totalorder %s1599_s14, %s1595_s20 }
 0x10d   : > { %p1597_p12 = pnand %p1596_p11, %p1754_p8  ;;  %p1602_p4 = por %p1601_p2, %p1600_p1 }
 0x10f   : > { %p1598_p0 = pneg %p1597_p12 }
 0x111   : > { %p1603_p6 = pnand %p1602_p4, %p1598_p0 }
 0x113   : > { %1606 = shalt.err (!%p1603_p6)
}
 0x114   : > { %1385 = dma.vmem_to_hbm [thread:$0]  (%p1754_p8), %s1981_s6, 128, %s1983_s5, %s1987_s27  }
 0x115 PF: > { %s2075_s13 = sld [smem:[#allocation16_spill]]  ;;  %s885_s21 = sand.u32 1, %s1649_s15  }
 0x116   : > { %p1398_p10 = pnand %p1036_p13, %p1758_p9  ;;  %s886_s8 = scalar_lea.sflag [#allocation5], %s885_s21 }
 0x118   : > { %p1399_p3 = pneg %p1398_p10 }
 0x11a   : > { %1640 = dma.done.wait (%p1399_p3), %s886_s8, 256  }
 0x11b   : > { %1642 = vsyncadd (%p1399_p3), %s886_s8, 4294967040  ;;  %s2076_s18 = sadd.s32 4294967294, %s2075_s13  }
 0x11c   : > { %s895_s25 = sand.u32 1, %s2076_s18  }
 0x11d   : > { %s896_s26 = scalar_lea.sflag [#allocation10], %s895_s25 }
 0x11e   : > { %1644 = dma.done.wait (%p1399_p3), %s896_s26, 256  }
 0x11f   : > { %1646 = vsyncadd (%p1399_p3), %s896_s26, 4294967040  ;;  %s25_s20 = sadd.s32 1, %s2075_s13   ;;  %s2077_s15 = smov %s1653_s16 }
 0x120   : > { %p22_p8 = scmp.ge.s32.totalorder %s25_s20, 4   ;;  %s2078_s16 = smov %s1657_s17 }
 0x121   : > { %s2079_s17 = smov %s1796_s22  ;;  %s2080_s18 = smov %s1665_s19 }
 0x122   : > { %s2081_s19 = smov %s2083_s9  ;;  %24 = sbr.rel (!%p22_p8) target bundleno = 11 (0xb), region = 119 }
 0x127   :  { %912 = vsyncpa [#allocation4], 1 }
 0x128   :  { %914 = vsyncpa [#allocation4 + $0x1], 1 }
 0x129   :  { %915 = vsyncpa [#allocation7], 1 }
 0x12a   :  { %917 = vsyncpa [#allocation7 + $0x1], 1 }
 0x12b   :  { %918 = vsyncpa [#allocation5], 1 }
 0x12c   :  { %920 = vsyncpa [#allocation5 + $0x1], 1 }
 0x12d   :  { %921 = vsyncpa [#allocation10], 1 }
 0x12e   :  { %923 = vsyncpa [#allocation10 + $0x1], 1 }

</bundles_post_ra>
